<compile_context>
chip_gen: v6e
topology: v6e:2x2x1
jax: 0.10.0
libtpu: 0.0.40
codegen_flags: <defaults>
</compile_context>

<pallas_src>
import functools

import jax
import jax.numpy as jnp
import numpy as np
from jax.experimental import pallas as pl
from jax.experimental.pallas import tpu as pltpu


def _round_up(a, m):
    return -(-a // m) * m


def _vmem_limit_bytes():
    """Generation-aware scoped-VMEM limit: half of physical VMEM."""
    try:
        info = pltpu.get_tpu_info()
        phys = int(getattr(info, "vmem_capacity_bytes", 0) or 0)
        if phys > 0:
            return max(32 * 1024 * 1024, min(phys // 2, 96 * 1024 * 1024))
    except Exception:
        pass
    return 32 * 1024 * 1024          # conservative fallback (fits v7x)


def _plan_tile_t(T, pad, cap, c_in, c_out, K, x_bytes, y_bytes, c_bytes, budget):
    """Pick (tile_T, multi_tile) so everything resident fits the VMEM budget."""
    halo = _round_up(pad, 128) if pad > 0 else 0
    # Bytes per time step that scale with tile_T:
    per_t = (2 * c_in * x_bytes            # x block (double-buffered)
             + 2 * c_out * y_bytes         # y block (double-buffered)
             + c_in * c_bytes              # halo-extended x scratch (single)
             + 2 * c_in * c_bytes          # casted x value + one shifted view
             + c_out * 4)                  # f32 accumulator value
    fixed = (2 * K * c_out * c_in * c_bytes    # weight block (double-buffered)
             + 2 * c_out * 4                   # bias block
             + c_in * halo * c_bytes           # scratch halo columns
             + (1 << 20))                      # compiler headroom
    fit = max(128, (budget - fixed) // max(per_t, 1))
    cap = max(128, min(int(cap), fit))
    if T <= cap:
        return T, False                    # single time tile (may be < 128 wide)
    tile = max(128, (cap // 128) * 128)    # lane-dense multi-tile
    if pad > 0:
        tile = max(tile, halo)             # carry correctness needs pad <= tile_T
    return tile, True


def _causal_conv_kernel(x_ref, w_ref, b_ref, o_ref, *scratch, tile_T, lpad,
                        pad, K, dilation, compute_dtype):
    # x_ref: (1, C_in, tile_T)   w_ref: (K, C_out, C_in)   b_ref: (C_out, 1) f32
    # o_ref: (1, C_out, tile_T)  scratch[0] (if pad>0): (C_in, lpad + tile_T)
    x_c = x_ref[0].astype(compute_dtype)                 # cast once per step
    c_in = x_c.shape[0]
    c_out = o_ref.shape[1]

    if pad > 0:
        xs = scratch[0]                                  # halo-extended x (compute dtype)
        i = pl.program_id(1)

        @pl.when(i == 0)                                 # causal left padding = zeros
        def _():
            xs[:, lpad - pad:lpad] = jnp.zeros((c_in, pad), compute_dtype)

        @pl.when(i > 0)                                  # carry prev tile's last `pad` cols
        def _():
            xs[:, lpad - pad:lpad] = xs[:, lpad + tile_T - pad:lpad + tile_T]

        xs[:, lpad:] = x_c                               # ONE lane-dense store (lpad % 128 == 0)

        acc = jnp.zeros((c_out, tile_T), jnp.float32)
        for j in range(K):                               # one MXU matmul per dilated tap
            s = pad - j * dilation                       # causal right-shift of tap j
            row = x_c if s == 0 else xs[:, lpad - s:lpad - s + tile_T]
            acc = acc + jnp.dot(w_ref[j], row, preferred_element_type=jnp.float32)
    else:                                                # K == 1: pointwise matmul
        acc = jnp.dot(w_ref[0], x_c, preferred_element_type=jnp.float32)

    acc = acc + b_ref[...].astype(jnp.float32)           # bias in f32
    o_ref[0] = acc.astype(o_ref.dtype)


def causal_conv1d(x, weight, bias, *, dilation=1, tile_t_cap=2048,
                  compute_dtype=None):
    """PyTorch CausalConv1d forward (groups == 1).

    x: (B, C_in, T), weight: (C_out, C_in, K), bias: (C_out,) -> (B, C_out, T)
    compute_dtype: MXU operand dtype (e.g. jnp.bfloat16 on v6e/v7x); the
    accumulation is always f32.
    """
    B, C_in, T = x.shape
    C_out, C_in_w, K = weight.shape
    if C_in_w != C_in:
        # TODO(synk): grouped conv (groups > 1) not implemented; groups=1 only.
        raise ValueError("only groups=1 is supported")
    pad = (K - 1) * dilation
    if compute_dtype is None:
        compute_dtype = x.dtype
    compute_dtype = jnp.dtype(compute_dtype)

    vmem_limit = _vmem_limit_bytes()
    budget = (vmem_limit * 3) // 4
    tile_T, multi = _plan_tile_t(T, pad, tile_t_cap, C_in, C_out, K,
                                 x.dtype.itemsize, x.dtype.itemsize,
                                 compute_dtype.itemsize, budget)
    nT = pl.cdiv(T, tile_T)
    lpad = _round_up(pad, 128) if pad > 0 else 0

    # (C_out, C_in, K) -> (K, C_out, C_in): tap-major so the kernel indexes one
    # (C_out, C_in) weight slab per tap.  Tiny; done once outside the kernel.
    w_taps = jnp.transpose(weight, (2, 0, 1)).astype(compute_dtype)
    b_col = bias.reshape(C_out, 1).astype(jnp.float32)

    kernel = functools.partial(
        _causal_conv_kernel, tile_T=tile_T, lpad=lpad, pad=pad, K=K,
        dilation=dilation, compute_dtype=compute_dtype)

    scratch = []
    if pad > 0:
        scratch.append(pltpu.VMEM((C_in, lpad + tile_T), compute_dtype))

    in_specs = [
        pl.BlockSpec((1, C_in, tile_T), lambda b, i: (b, 0, i)),
        pl.BlockSpec((K, C_out, C_in), lambda b, i: (0, 0, 0)),
        pl.BlockSpec((C_out, 1), lambda b, i: (0, 0)),
    ]

    cost = pl.CostEstimate(
        flops=int(2 * B * C_out * T * K * C_in),
        transcendentals=0,
        bytes_accessed=int(x.size * x.dtype.itemsize
                           + B * C_out * T * x.dtype.itemsize
                           + K * C_out * C_in * compute_dtype.itemsize
                           + C_out * 4))

    # Time axis must stay sequential only when the halo carry is live.
    time_sem = "arbitrary" if (multi and pad > 0) else "parallel"

    return pl.pallas_call(
        kernel,
        out_shape=jax.ShapeDtypeStruct((B, C_out, T), x.dtype),
        grid_spec=pltpu.PrefetchScalarGridSpec(
            num_scalar_prefetch=0,
            grid=(B, nT),
            in_specs=in_specs,
            out_specs=pl.BlockSpec((1, C_out, tile_T), lambda b, i: (b, 0, i)),
            scratch_shapes=scratch),
        compiler_params=pltpu.CompilerParams(
            dimension_semantics=("parallel", time_sem),
            vmem_limit_bytes=vmem_limit),
        cost_estimate=cost,
    )(x, w_taps, b_col)


def _reference(x, weight, bias, dilation):
    pad = (weight.shape[-1] - 1) * dilation
    y = jax.lax.conv_general_dilated(
        x, weight, window_strides=(1,), padding=[(pad, 0)],
        rhs_dilation=(dilation,), dimension_numbers=("NCH", "OIH", "NCH"))
    return y + bias[None, :, None]


def _make_inputs(key, B, C_in, C_out, T, K):
    kx, kw, kb = jax.random.split(key, 3)
    fan_in = C_in * K
    bound = 1.0 / np.sqrt(fan_in)              # Conv1d-like init
    x = jax.random.normal(kx, (B, C_in, T), dtype=jnp.float32)
    w = jax.random.uniform(kw, (C_out, C_in, K), jnp.float32, -bound, bound)
    b = jax.random.uniform(kb, (C_out,), jnp.float32, -bound, bound)
    return x, w, b


if __name__ == "__main__":
    k1, k2, k3 = jax.random.split(jax.random.PRNGKey(0), 3)

    # Case 1: module-like small shapes, single (sub-128-wide) time tile.
    B, C_in, C_out, T, K, dil = 2, 4, 8, 16, 3, 2
    x, w, b = _make_inputs(k1, B, C_in, C_out, T, K)
    y = jax.block_until_ready(causal_conv1d(x, w, b, dilation=dil))
    np.testing.assert_allclose(np.asarray(y), np.asarray(_reference(x, w, b, dil)),
                               rtol=1e-5, atol=1e-5)
    assert y.shape == (B, C_out, T)

    # Case 2: multi time-tile path (carry-based halo) with a partial last tile.
    T2 = 320
    x2, w2, b2 = _make_inputs(k2, B, C_in, C_out, T2, K)
    y2_ref = _reference(x2, w2, b2, dil)
    y2 = jax.block_until_ready(
        causal_conv1d(x2, w2, b2, dilation=dil, tile_t_cap=128))
    np.testing.assert_allclose(np.asarray(y2), np.asarray(y2_ref),
                               rtol=1e-5, atol=1e-5)

    # Case 3: bf16 MXU operands with f32 accumulation (v6e/v7x fast path).
    y3 = jax.block_until_ready(
        causal_conv1d(x2, w2, b2, dilation=dil, tile_t_cap=128,
                      compute_dtype=jnp.bfloat16))
    np.testing.assert_allclose(np.asarray(y3), np.asarray(y2_ref),
                               rtol=2e-2, atol=2e-2)

    # Case 4: K == 1 (pad == 0) degenerates to a pointwise matmul.
    x4, w4, b4 = _make_inputs(k3, B, C_in, C_out, T, 1)
    y4 = jax.block_until_ready(causal_conv1d(x4, w4, b4, dilation=1))
    np.testing.assert_allclose(np.asarray(y4), np.asarray(_reference(x4, w4, b4, 1)),
                               rtol=1e-5, atol=1e-5)

    print("KERNEL_OK")
</pallas_src>

<mosaic_0001>
module attributes {stable_mosaic.version = 11 : i64} {
  func.func @_causal_conv_kernel(%arg0: i32, %arg1: i32, %arg2: memref<1x4x16xf32, #tpu.memory_space<vmem>>, %arg3: memref<3x8x4xf32, #tpu.memory_space<vmem>>, %arg4: memref<8x1xf32, #tpu.memory_space<vmem>>, %arg5: memref<1x8x16xf32, #tpu.memory_space<vmem>>, %arg6: memref<4x144xf32, #tpu.memory_space<vmem>>) attributes {dimension_semantics = [#tpu.dimension_semantics<parallel>, #tpu.dimension_semantics<parallel>], iteration_bounds = array<i64: 2, 1>, scalar_prefetch = 0 : i64, scratch_operands = 1 : i64, tpu.core_type = #tpu.core_type<tc>, window_params = [{transform_indices = @transform_0, window_bounds = array<i64: 1, 4, 16>}, {pipeline_mode = #tpu.pipeline_mode<synchronous>, transform_indices = @transform_1, window_bounds = array<i64: 3, 8, 4>}, {pipeline_mode = #tpu.pipeline_mode<synchronous>, transform_indices = @transform_2, window_bounds = array<i64: 8, 1>}, {transform_indices = @transform_3, window_bounds = array<i64: 1, 8, 16>}]} {
    %c0 = arith.constant 0 : index
    %c0_0 = arith.constant 0 : index
    %c0_1 = arith.constant 0 : index
    %0 = vector.load %arg2[%c0, %c0_0, %c0_1] : memref<1x4x16xf32, #tpu.memory_space<vmem>>, vector<1x4x16xf32>
    %1 = vector.shape_cast %0 : vector<1x4x16xf32> to vector<4x16xf32>
    %c0_i32 = arith.constant 0 : i32
    %2 = arith.cmpi eq, %arg1, %c0_i32 : i32
    %3 = arith.extui %2 : i1 to i32
    %c0_i32_2 = arith.constant 0 : i32
    %4 = arith.cmpi ne, %3, %c0_i32_2 : i32
    scf.if %4 {
      %cst_23 = arith.constant 0.000000e+00 : f32
      %30 = vector.broadcast %cst_23 : f32 to vector<4x4xf32>
      %c0_24 = arith.constant 0 : index
      %c124_25 = arith.constant 124 : index
      %31 = vector.load %arg6[%c0_24, %c124_25] : memref<4x144xf32, #tpu.memory_space<vmem>>, vector<4x4xf32>
      tpu.vector_store %arg6[%c0_24, %c124_25], %30 {strides = array<i32>} : memref<4x144xf32, #tpu.memory_space<vmem>>, vector<4x4xf32>,
    } else {
    }
    %c0_i32_3 = arith.constant 0 : i32
    %5 = arith.cmpi sgt, %arg1, %c0_i32_3 : i32
    %6 = arith.extui %5 : i1 to i32
    %c0_i32_4 = arith.constant 0 : i32
    %7 = arith.cmpi ne, %6, %c0_i32_4 : i32
    scf.if %7 {
      %c0_23 = arith.constant 0 : index
      %c140 = arith.constant 140 : index
      %30 = vector.load %arg6[%c0_23, %c140] : memref<4x144xf32, #tpu.memory_space<vmem>>, vector<4x4xf32>
      %c0_24 = arith.constant 0 : index
      %c124_25 = arith.constant 124 : index
      %31 = vector.load %arg6[%c0_24, %c124_25] : memref<4x144xf32, #tpu.memory_space<vmem>>, vector<4x4xf32>
      tpu.vector_store %arg6[%c0_24, %c124_25], %30 {strides = array<i32>} : memref<4x144xf32, #tpu.memory_space<vmem>>, vector<4x4xf32>,
    } else {
    }
    %c0_5 = arith.constant 0 : index
    %c128 = arith.constant 128 : index
    %8 = vector.load %arg6[%c0_5, %c128] : memref<4x144xf32, #tpu.memory_space<vmem>>, vector<4x16xf32>
    tpu.vector_store %arg6[%c0_5, %c128], %1 {strides = array<i32>} : memref<4x144xf32, #tpu.memory_space<vmem>>, vector<4x16xf32>,
    %cst = arith.constant 0.000000e+00 : f32
    %9 = vector.broadcast %cst : f32 to vector<8x16xf32>
    %c0_6 = arith.constant 0 : index
    %c124 = arith.constant 124 : index
    %10 = vector.load %arg6[%c0_6, %c124] : memref<4x144xf32, #tpu.memory_space<vmem>>, vector<4x16xf32>
    %c0_7 = arith.constant 0 : index
    %c0_8 = arith.constant 0 : index
    %c0_9 = arith.constant 0 : index
    %11 = vector.load %arg3[%c0_7, %c0_8, %c0_9] : memref<3x8x4xf32, #tpu.memory_space<vmem>>, vector<1x8x4xf32>
    %12 = vector.shape_cast %11 : vector<1x8x4xf32> to vector<8x4xf32>
    %cst_10 = arith.constant dense<0.000000e+00> : vector<8x16xf32>
    %13 = tpu.matmul %12, %10, %cst_10 {dimension_numbers = #tpu.dot_dimension_numbers<[1], [0], [0], [1], [0, 0, 1, 1], [], []>} : vector<8x4xf32>, vector<4x16xf32>, vector<8x16xf32> -> vector<8x16xf32>
    %14 = arith.addf %9, %13 : vector<8x16xf32>
    %c0_11 = arith.constant 0 : index
    %c126 = arith.constant 126 : index
    %15 = vector.load %arg6[%c0_11, %c126] : memref<4x144xf32, #tpu.memory_space<vmem>>, vector<4x16xf32>
    %c1 = arith.constant 1 : index
    %c0_12 = arith.constant 0 : index
    %c0_13 = arith.constant 0 : index
    %16 = vector.load %arg3[%c1, %c0_12, %c0_13] : memref<3x8x4xf32, #tpu.memory_space<vmem>>, vector<1x8x4xf32>
    %17 = vector.shape_cast %16 : vector<1x8x4xf32> to vector<8x4xf32>
    %cst_14 = arith.constant dense<0.000000e+00> : vector<8x16xf32>
    %18 = tpu.matmul %17, %15, %cst_14 {dimension_numbers = #tpu.dot_dimension_numbers<[1], [0], [0], [1], [0, 0, 1, 1], [], []>} : vector<8x4xf32>, vector<4x16xf32>, vector<8x16xf32> -> vector<8x16xf32>
    %19 = arith.addf %14, %18 : vector<8x16xf32>
    %c2 = arith.constant 2 : index
    %c0_15 = arith.constant 0 : index
    %c0_16 = arith.constant 0 : index
    %20 = vector.load %arg3[%c2, %c0_15, %c0_16] : memref<3x8x4xf32, #tpu.memory_space<vmem>>, vector<1x8x4xf32>
    %21 = vector.shape_cast %20 : vector<1x8x4xf32> to vector<8x4xf32>
    %cst_17 = arith.constant dense<0.000000e+00> : vector<8x16xf32>
    %22 = tpu.matmul %21, %1, %cst_17 {dimension_numbers = #tpu.dot_dimension_numbers<[1], [0], [0], [1], [0, 0, 1, 1], [], []>} : vector<8x4xf32>, vector<4x16xf32>, vector<8x16xf32> -> vector<8x16xf32>
    %23 = arith.addf %19, %22 : vector<8x16xf32>
    %c0_18 = arith.constant 0 : index
    %c0_19 = arith.constant 0 : index
    %24 = vector.load %arg4[%c0_18, %c0_19] : memref<8x1xf32, #tpu.memory_space<vmem>>, vector<8x1xf32>
    %25 = vector.broadcast %24 : vector<8x1xf32> to vector<8x16xf32>
    %26 = arith.addf %23, %25 : vector<8x16xf32>
    %c0_20 = arith.constant 0 : index
    %c0_21 = arith.constant 0 : index
    %c0_22 = arith.constant 0 : index
    %27 = vector.load %arg5[%c0_20, %c0_21, %c0_22] : memref<1x8x16xf32, #tpu.memory_space<vmem>>, vector<1x8x16xf32>
    %28 = vector.shape_cast %27 : vector<1x8x16xf32> to vector<8x16xf32>
    %29 = vector.shape_cast %26 : vector<8x16xf32> to vector<1x8x16xf32>
    tpu.vector_store %arg5[%c0_20, %c0_21, %c0_22], %29 {strides = array<i32>} : memref<1x8x16xf32, #tpu.memory_space<vmem>>, vector<1x8x16xf32>,
    return
  }
  func.func @transform_0(%arg0: i32, %arg1: i32) -> (i32, i32, i32) {
    %c0_i32 = arith.constant 0 : i32
    %c0_i32_0 = arith.constant 0 : i32
    return %arg0, %c0_i32, %arg1 : i32, i32, i32
  }
  func.func @transform_1(%arg0: i32, %arg1: i32) -> (i32, i32, i32) {
    %c0_i32 = arith.constant 0 : i32
    %c0_i32_0 = arith.constant 0 : i32
    %c0_i32_1 = arith.constant 0 : i32
    %c0_i32_2 = arith.constant 0 : i32
    return %c0_i32, %c0_i32_0, %c0_i32_1 : i32, i32, i32
  }
  func.func @transform_2(%arg0: i32, %arg1: i32) -> (i32, i32) {
    %c0_i32 = arith.constant 0 : i32
    %c0_i32_0 = arith.constant 0 : i32
    %c0_i32_1 = arith.constant 0 : i32
    return %c0_i32, %c0_i32_0 : i32, i32
  }
  func.func @transform_3(%arg0: i32, %arg1: i32) -> (i32, i32, i32) {
    %c0_i32 = arith.constant 0 : i32
    %c0_i32_0 = arith.constant 0 : i32
    return %arg0, %c0_i32, %arg1 : i32, i32, i32
  }
}

</mosaic_0001>

<bundles_post_ra>
// kernel: tpu_custom_call.1
= control target key start
LH: loop header
LB: loop body
LE: loop exit
PB: predicated region body
PF: predicated region fallthrough
CT: control target
= control target key end

     0   :  { %8 = vsyncpa [#allocation4], 0  ;;  %s878_s0 = inlined_call_operand.vmem [shape: f32[2,4,16], index: 0, kind: input, shape index: {}]   ;;  %s879_s1 = inlined_call_operand.vmem [shape: f32[3,8,4], index: 1, kind: input, shape index: {}]   ;;  %s880_s2 = inlined_call_operand.vmem [shape: f32[8,1], index: 2, kind: input, shape index: {}]   ;;  %s881_s3 = inlined_call_operand.hbm [shape: f32[2,8,16], index: 3, kind: output, shape index: {}]  }
   0x1   :  { %10 = vsyncpa [#allocation4 + $0x1], 0  ;;  %s760_s12 = smov 0   ;;  %s762_s13 = smov 0  }
   0x2   :  { %s764_s14 = smov 0   ;;  %s766_s15 = smov 0  }
   0x3   :  { %s768_s16 = smov 0   ;;  %s770_s17 = smov 0  }
   0x4 LB: > { %s554_s18 = sadd.s32 4294967295, %s732_s17   ;;  %s555_s19 = sadd.s32 4294967294, %s732_s17   ;;  %s732_s17 = sphi %s770_s17, %s16_s17   ;;  %s728_s16 = sphi %s768_s16, %s888_s16   ;;  %s724_s15 = sphi %s766_s15, %s887_s15   ;;  %s720_s14 = sphi %s764_s14, %s886_s14   ;;  %s716_s13 = sphi %s762_s13, %s885_s13   ;;  %s712_s12 = sphi %s760_s12, %s884_s12  }
   0x5   : > { %s28_s20 = sadd.s32 1, %s728_s16  ;;  %s107_s21 = sadd.s32 1, %s720_s14 }
   0x6   : > { %p30_p0 = scmp.ge.s32.totalorder %s28_s20, 2  ;;  %p117_p1 = scmp.ne.s32.totalorder %s720_s14, %s716_s13 }
   0x7   : > { %p118_p2 = scmp.eq.s32.totalorder %s554_s18, 1  ;;  %p123_p3 = scmp.ne.s32.totalorder %s716_s13, %s712_s12 }
   0x8   : > { %s890_s20 = smov (%p30_p0, %s28_s20), 0  ;;  %p124_p5 = scmp.eq.s32.totalorder %s555_s19, 1 }
   0x9   : > { %p800_p4 = por %p118_p2, %p117_p1  ;;  %s102_s23 = ssub.s32 %s728_s16, %s890_s20 }
   0xa   : > { %p558_p6 = scmp.ge.s32.totalorder %s732_s17, 1  ;;  %p105_p7 = scmp.eq.s32.totalorder %s102_s23, 0 }
   0xb   : > { %p807_p8 = por %p124_p5, %p123_p3  ;;  %p158_p9 = scmp.lt.s32.totalorder %s732_s17, 3 }
   0xc   : > { %s813_s25 = scalar_select %p105_p7, %s720_s14, %s107_s21  }
   0xd   : > { %p159_p10 = pnand %p558_p6, %p158_p9 }
   0xe   : > { %p184_p11 = scmp.lt.s32.totalorder (!%p159_p10), %s724_s15, 1  ;;  %s737_s4 = smov (!%p159_p10), 4  }
   0xf   : > { %162 = sbr.rel (%p159_p10) target bundleno = 368 (0x170), region = 32  ;;  %s738_s5 = smov (!%p159_p10), 2  }
  0x10   : > { %s181_s21 = sand.u32 (!%p159_p10), 1, %s716_s13   ;;  %s739_s7 = smov (!%p159_p10), [#allocation3]  }
  0x11   : > { %s559_s23 = sshll.u32 (!%p159_p10), %s181_s21, 3 }
  0x14   : > { %vm196_vm0 = vcmask 1044448   ;;  %v734_v0 = vmov 0.0   ;;  %s185_s26 = scalar_select %p184_p11, %s724_s15, 1  ;;  %vm209_vm1 = vcmask 125952   ;;  %vm735_vm2 = vmmov 0   ;;  %v459_v5 = vld [vmem:[%s880_s2] sm:$0xff] }
  0x15   : > { %197 = vst.msk [vmem:[#allocation2] sm:$0xf] %vm196_vm0, %v734_v0  ;;  %579 = vmatprep.subr.mxu0 %v734_v0  ;;  %584 = vmatprep.subr.mxu1 %v734_v0  ;;  %v736_v2 = vmov 0   ;;  %vm221_vm3 = vcmask 15360   ;;  %vm223_vm4 = vcmask 31744   ;;  %vm227_vm5 = vcmask 1043456  }
  0x16   : > { %s560_s27 = sshll.u32 %s185_s26, 2  ;;  %581 = vmatprep.mubr.msk.f32.mxu0 %vm735_vm2, %v734_v0  ;;  %586 = vmatprep.mubr.msk.f32.mxu1 %vm735_vm2, %v734_v0  ;;  %v561_v10 = vld [vmem:[%s879_s1 + $0x8] sm:$0xff]  ;;  %v212_v13 = vld [vmem:[%s879_s1] sm:$0xff]  ;;  %v566_v14 = vld [vmem:[%s879_s1 + $0x10] sm:$0xff]  ;;  %s570_s26 = sshll.u32 %s724_s15, 7  ;;  %vm466_vm6 = vcmask 130048  }
  0x17   : > { %s190_s30 = scalar_lea.vmem %s878_s0, %s560_s27  ;;  %654 = vset.pattern.permute.xlu0 %v736_v2  ;;  %s183_s27 = scalar_lea.vmem [#allocation3], %s559_s23 }
  0x18   : > { %v191_v1 = vld [vmem:[%s190_s30] sm:$0xf]  ;;  %s483_s28 = sshll.u32 %s183_s27, 4  ;;  %s660_s15 = sshll.u32 %s739_s7, 4  ;;  %s484_s28 = int_to_ptr.vmem [resolvable:$true] %s483_s28  ;;  %s661_s15 = int_to_ptr.vmem [resolvable:$false] %s660_s15 }
  0x19   : > { %210 = vst.msk [vmem:[#allocation2 + $0x4] sm:$0xf] %vm209_vm1, %v191_v1  ;;  %s656_s6 = scalar_lea.vmem %s484_s28, 128  ;;  %s662_s8 = scalar_lea.vmem %s661_s15, 256 }
  0x1a   : > { %p657_p12 = scmp.ne.s32.totalorder %s484_s28, %s656_s6  ;;  %p663_p1 = scmp.lt.s32.totalorder %s484_s28, %s661_s15 }
  0x1b   : > { %p664_p2 = scmp.lt.s32.totalorder %s662_s8, %s656_s6 }
  0x1c   : > { %p658_p13 = pnand %p657_p12, %p800_p4 }
  0x1d   : > { %p665_p3 = por %p664_p2, %p663_p1 }
  0x1e   : > { %p659_p0 = pneg %p658_p13 }
  0x20   : > { %v211_v3 = vld [vmem:[#allocation2] sm:$0xff]  ;;  %p666_p5 = pnand %p665_p3, %p659_p0 }
  0x21   : > { %300 = vrot.lane.b32.xlu1 %v211_v3, %s737_s4  ;;  %217 = vrot.lane.b32.xlu0 %v211_v3, %s738_s5  ;;  %v216_v4 = vcombine.high %v211_v3, %v211_v3 }
  0x25   : > { %302 = vrot.lane.b32.xlu1 %v216_v4, %s737_s4  ;;  %219 = vrot.lane.b32.xlu0 %v216_v4, %s738_s5  ;;  %s481_s4 = scalar_lea.hbm %s881_s3, %s570_s26  ;;  %s469_s5 = scalar_lea.sflag [#allocation4], %s181_s21 }
  0x29   : > { %462 = vperm.xlu0 %654, %v459_v5  }
  0x93   : > { %v301_v6 = vpop.permute.xlu1 %300  ;;  %v218_v7 = vpop.permute.xlu0 %217 }
  0x97   : > { %v303_v8 = vpop.permute.xlu1 %302  ;;  %v220_v9 = vpop.permute.xlu0 %219 }
  0x98   : > { %v222_v11 = vsel %vm221_vm3, %v218_v7, %v220_v9  ;;  %v304_v12 = vsel %vm223_vm4, %v301_v6, %v303_v8 }
  0x99   : > { %580 = vmatpush3.msk.msra.mxu0 %vm227_vm5, %v222_v11  ;;  %585 = vmatpush3.msk.msra.mxu1 %vm227_vm5, %v304_v12 }
  0x9a   : > { %582 = vmatmul.mubr.msk.f32.vlgmr.msra.gmra.mxu0 %vm223_vm4, %v561_v10  ;;  %589 = vmatprep.subr.mxu0 %v734_v0 }
  0x9b   : > { %587 = vmatmul.mubr.msk.f32.vlgmr.msra.gmra.mxu1 %vm223_vm4, %v212_v13  ;;  %590 = vmatpush3.msk.msra.mxu0 %vm227_vm5, %v191_v1 }
  0x9c   : > { %591 = vmatprep.mubr.msk.f32.mxu0 %vm735_vm2, %v734_v0 }
  0x9e   : > { %592 = vmatmul.mubr.msk.f32.vlgmr.msra.gmra.mxu0 %vm223_vm4, %v566_v14 }
  0xa4   : > { %v463_v21 = vpop.permute.xlu0 %462 }
 0x15a   : > { %v296_v15 = vpop.f32.mrf.mxu0 }
 0x15b   : > { %v376_v16 = vpop.f32.mrf.mxu1 }
 0x15c   : > { %v583_v17 = vpop.f32.mrf.mxu0  ;;  %v377_v18 = vadd.f32 %v376_v16, %v296_v15 }
 0x15d   : > { %v588_v19 = vpop.f32.mrf.mxu1 }
 0x15e   : > { %v454_v20 = vpop.f32.mrf.mxu0 }
 0x15f   : > { %v458_v22 = vadd.f32 %v454_v20, %v377_v18 }
 0x160   : > { %v593_v23 = vpop.f32.mrf.mxu0 }
 0x161   : > { %v465_v24 = vadd.f32 %v463_v21, %v458_v22 }
 0x163   : > { %467 = vst.msk [vmem:[%s183_s27] sm:$0xff] %vm466_vm6, %v465_v24 }
 0x164   : > { %669 = shalt.err (!%p666_p5)
}
 0x165   : > { %s670_s9 = scalar_lea.hbm %s481_s4, 128  ;;  %s674_s18 = scalar_lea.hbm %s881_s3, 256 }
 0x166   : > { %p671_p6 = scmp.ne.s32.totalorder %s481_s4, %s670_s9  ;;  %p675_p10 = scmp.lt.s32.totalorder %s481_s4, %s881_s3 }
 0x167   : > { %p676_p11 = scmp.lt.s32.totalorder %s674_s18, %s670_s9 }
 0x168   : > { %p672_p7 = pnand %p671_p6, %p800_p4 }
 0x169   : > { %p677_p12 = por %p676_p11, %p675_p10 }
 0x16a   : > { %p673_p9 = pneg %p672_p7 }
 0x16c   : > { %p678_p13 = pnand %p677_p12, %p673_p9 }
 0x16e   : > { %681 = shalt.err (!%p678_p13)
}
 0x16f   : > { %594 = dma.vmem_to_hbm [thread:$0]  (%p800_p4), %s484_s28, 128, %s481_s4, %s469_s5  }
 0x170 PF: > { %p600_p0 = scmp.ge.s32.totalorder %s732_s17, 2  ;;  %s495_s23 = sand.u32 1, %s712_s12  }
 0x171   : > { %s496_s26 = scalar_lea.sflag [#allocation4], %s495_s23 }
 0x172   : > { %p597_p1 = pnand %p600_p0, %p807_p8 }
 0x174   : > { %p598_p2 = pneg %p597_p1 }
 0x176   : > { %707 = dma.done.wait (%p598_p2), %s496_s26, 128  }
 0x177   : > { %709 = vsyncadd (%p598_p2), %s496_s26, 4294967168  ;;  %s16_s17 = sadd.s32 1, %s732_s17   ;;  %s884_s12 = smov %s716_s13 }
 0x178   : > { %p13_p3 = scmp.ge.s32.totalorder %s16_s17, 4   ;;  %s885_s13 = smov %s720_s14 }
 0x179   : > { %s886_s14 = smov %s813_s25  ;;  %s887_s15 = smov %s728_s16 }
 0x17a   : > { %s888_s16 = smov %s890_s20  ;;  %15 = sbr.rel (!%p13_p3) target bundleno = 4 (0x4), region = 77 }
 0x17f   :  { %501 = vsyncpa [#allocation4], 1 }
 0x180   :  { %503 = vsyncpa [#allocation4 + $0x1], 1 }

</bundles_post_ra>
